<compile_context>
chip_gen: v7x
topology: tpu7x:2x2x1
jax: 0.10.0
libtpu: 0.0.40
codegen_flags: <defaults>
</compile_context>

<pallas_src>
import jax
import jax.numpy as jnp
from jax.experimental import pallas as pl
from jax.experimental.pallas import tpu as pltpu

CODES = {'A': 0, 'C': 1, 'G': 2, 'T': 3, 'N': 4}

_LANE = 128                     # lane width
_MAX_TILE_L = 32768             # lanes per grid step when tiling long sequences
_SINGLE_BLOCK_MAX_L = 262144    # up to this many bases: one lane block (≈8.5 MiB VMEM)


def _round_up(x, m):
    return ((x + m - 1) // m) * m


def _seq2tensor_kernel(codes_ref, out_ref):
    # codes_ref: (1, T) int8 ; out_ref: (4, T) float32
    codes = codes_ref[...].astype(jnp.int32)                        # (1, T)
    c = jnp.broadcast_to(codes, out_ref.shape)                      # (4, T)
    rows = jax.lax.broadcasted_iota(jnp.int32, out_ref.shape, 0)    # channel idx 0..3
    onehot = (c == rows).astype(jnp.float32)                        # one-hot of first 4 classes
    # 'N' (id 4) positions -> 0.25 in every channel.  Codes outside [0,4]
    # silently give all-zero columns (PyTorch one_hot would raise instead).
    out_ref[...] = jnp.where(c == 4, jnp.float32(0.25), onehot)


def _encode_batch(codes_2d):
    """codes_2d: (B, L) integer ids in [0, 4] -> (B, 4, L) float32 one-hot."""
    codes_2d = jnp.asarray(codes_2d)
    B, L = codes_2d.shape

    # Pick the lane tile: whole sequence for typical lengths, else 32K tiles.
    if L <= _SINGLE_BLOCK_MAX_L:
        tile = _round_up(max(L, _LANE), _LANE)
    else:
        tile = _MAX_TILE_L
    Lp = _round_up(L, tile)

    # int8 codes (4x less input DMA than int32); pad lanes with 0 ('A') —
    # padded columns are computed then sliced off (harmless, cheap).
    codes = jnp.pad(codes_2d.astype(jnp.int8), ((0, 0), (0, Lp - L)))
    codes3d = codes[:, None, :]                                     # (B, 1, Lp)

    n_lane_tiles = Lp // tile
    out = pl.pallas_call(
        _seq2tensor_kernel,
        out_shape=jax.ShapeDtypeStruct((B, 4, Lp), jnp.float32),
        grid_spec=pltpu.PrefetchScalarGridSpec(
            num_scalar_prefetch=0,
            grid=(B, n_lane_tiles),
            in_specs=[pl.BlockSpec((None, 1, tile), lambda b, l: (b, 0, l))],
            out_specs=pl.BlockSpec((None, 4, tile), lambda b, l: (b, 0, l)),
        ),
        compiler_params=pltpu.CompilerParams(
            dimension_semantics=("parallel", "parallel")),
    )(codes3d)
    return out if Lp == L else out[:, :, :L]


def _str_to_codes(s):
    # Host-side glue: Python string -> integer ids (no device equivalent).
    return [CODES[x.upper()] for x in s]


def seq2tensor(seq):
    """JAX equivalent of Seq2Tensor.forward.

    `seq` may be:
      - a float array: returned unchanged (mirrors the isinstance(FloatTensor) branch)
      - a Python string of A/C/G/T/N
      - an integer array of ids in [0, 4]
    Returns a (4, L) float32 array.
    """
    if isinstance(seq, jnp.ndarray) and jnp.issubdtype(seq.dtype, jnp.floating):
        return seq
    if isinstance(seq, str):
        codes = jnp.asarray(_str_to_codes(seq), dtype=jnp.int8)
    else:
        codes = jnp.asarray(seq).astype(jnp.int8)
    return _encode_batch(codes[None, :])[0]


def seq2tensor_batch(seqs):
    """Encode many equal-length sequences in one pallas_call -> (B, 4, L)."""
    if isinstance(seqs, (list, tuple)) and len(seqs) and isinstance(seqs[0], str):
        codes = jnp.asarray([_str_to_codes(s) for s in seqs], dtype=jnp.int8)
    else:
        codes = jnp.asarray(seqs).astype(jnp.int8)
    return _encode_batch(codes)


def _reference(codes):
    """Pure-JAX reference mirroring the PyTorch code path."""
    onehot = jax.nn.one_hot(codes, 5, dtype=jnp.float32)            # (L, 5)
    is_n = (onehot[:, 4] == 1.0)[:, None]                           # (L, 1)
    onehot = jnp.where(is_n, 0.25, onehot)
    return onehot[:, :4].T                                          # (4, L)


if __name__ == "__main__":
    key = jax.random.PRNGKey(0)

    # Single sequence, length deliberately not a multiple of 128.
    L = 200
    codes = jax.random.randint(key, (L,), 0, 5, dtype=jnp.int32)
    out = jax.block_until_ready(seq2tensor(codes))
    ref = _reference(codes)
    assert out.shape == (4, L), out.shape
    assert out.dtype == jnp.float32
    assert jnp.allclose(out, ref), "mismatch vs reference (single)"

    # String input.
    s = "ACGTN" * 8
    out_s = jax.block_until_ready(seq2tensor(s))
    codes_s = jnp.asarray(_str_to_codes(s), dtype=jnp.int32)
    assert jnp.allclose(out_s, _reference(codes_s)), "mismatch vs reference (string)"

    # Batched path: several sequences in one kernel launch.
    B, Lb = 3, 137
    codes_b = jax.random.randint(jax.random.PRNGKey(1), (B, Lb), 0, 5, dtype=jnp.int32)
    out_b = jax.block_until_ready(seq2tensor_batch(codes_b))
    assert out_b.shape == (B, 4, Lb), out_b.shape
    ref_b = jnp.stack([_reference(codes_b[i]) for i in range(B)])
    assert jnp.allclose(out_b, ref_b), "mismatch vs reference (batched)"

    # Float passthrough branch.
    f = jnp.ones((4, 8), jnp.float32)
    assert seq2tensor(f) is f

    print("KERNEL_OK")
</pallas_src>

<mosaic_0001>
module attributes {stable_mosaic.version = 11 : i64} {
  func.func @_seq2tensor_kernel(%arg0: i32, %arg1: i32, %arg2: memref<1x1x256xi8, #tpu.memory_space<vmem>>, %arg3: memref<1x4x256xf32, #tpu.memory_space<vmem>>) attributes {dimension_semantics = [#tpu.dimension_semantics<parallel>, #tpu.dimension_semantics<parallel>], iteration_bounds = array<i64: 1, 1>, scalar_prefetch = 0 : i64, scratch_operands = 0 : i64, tpu.core_type = #tpu.core_type<tc>, window_params = [{transform_indices = @transform_0, window_bounds = array<i64: 1, 1, 256>}, {transform_indices = @transform_1, window_bounds = array<i64: 1, 4, 256>}]} {
    %c0 = arith.constant 0 : index
    %c0_0 = arith.constant 0 : index
    %c0_1 = arith.constant 0 : index
    %0 = vector.load %arg2[%c0, %c0_0, %c0_1] : memref<1x1x256xi8, #tpu.memory_space<vmem>>, vector<1x1x256xi8>
    %1 = vector.shape_cast %0 : vector<1x1x256xi8> to vector<1x256xi8>
    %2 = arith.extsi %1 : vector<1x256xi8> to vector<1x256xi32>
    %3 = vector.shape_cast %2 : vector<1x256xi32> to vector<1x256xi32>
    %4 = vector.broadcast %3 : vector<1x256xi32> to vector<4x256xi32>
    %5 = tpu.iota {dimensions = array<i32: 0>} : vector<4x256xi32>
    %6 = arith.cmpi eq, %4, %5 : vector<4x256xi32>
    %7 = arith.extui %6 : vector<4x256xi1> to vector<4x256xi32>
    %8 = arith.sitofp %7 : vector<4x256xi32> to vector<4x256xf32>
    %c4_i32 = arith.constant 4 : i32
    %9 = vector.broadcast %c4_i32 : i32 to vector<4x256xi32>
    %10 = arith.cmpi eq, %4, %9 : vector<4x256xi32>
    %cst = arith.constant 2.500000e-01 : f32
    %11 = vector.broadcast %cst : f32 to vector<4x256xf32>
    %12 = arith.select %10, %11, %8 : vector<4x256xi1>, vector<4x256xf32>
    %c0_2 = arith.constant 0 : index
    %c0_3 = arith.constant 0 : index
    %c0_4 = arith.constant 0 : index
    %13 = vector.load %arg3[%c0_2, %c0_3, %c0_4] : memref<1x4x256xf32, #tpu.memory_space<vmem>>, vector<1x4x256xf32>
    %14 = vector.shape_cast %13 : vector<1x4x256xf32> to vector<4x256xf32>
    %15 = vector.shape_cast %12 : vector<4x256xf32> to vector<1x4x256xf32>
    tpu.vector_store %arg3[%c0_2, %c0_3, %c0_4], %15 {strides = array<i32>} : memref<1x4x256xf32, #tpu.memory_space<vmem>>, vector<1x4x256xf32>,
    return
  }
  func.func @transform_0(%arg0: i32, %arg1: i32) -> (i32, i32, i32) {
    %c0_i32 = arith.constant 0 : i32
    %c0_i32_0 = arith.constant 0 : i32
    return %arg0, %c0_i32, %arg1 : i32, i32, i32
  }
  func.func @transform_1(%arg0: i32, %arg1: i32) -> (i32, i32, i32) {
    %c0_i32 = arith.constant 0 : i32
    %c0_i32_0 = arith.constant 0 : i32
    return %arg0, %c0_i32, %arg1 : i32, i32, i32
  }
}

</mosaic_0001>

<bundles_post_ra>
// kernel: tpu_custom_call.1
= control target key start
LH: loop header
LB: loop body
LE: loop exit
PB: predicated region body
PF: predicated region fallthrough
CT: control target
= control target key end

     0   :  { %6 = vsyncpa [#allocation3], 0  ;;  %s161_s0 = inlined_call_operand.hbm [shape: s8[1,1,256], index: 0, kind: input, shape index: {}]   ;;  %s162_s1 = inlined_call_operand.hbm [shape: f32[1,4,256], index: 1, kind: output, shape index: {}]  }
   0x1   :  { %7 = vsyncpa [#allocation4], 0  ;;  %s124_s6 = smov [#allocation2]   ;;  %s76_s10 = scalar_lea.hbm %s161_s0, 32 }
   0x2   :  { %s14_s7 = sshll.u32 %s124_s6, 4  ;;  %p77_p0 = scmp.ne.s32.totalorder %s161_s0, %s76_s10  ;;  %s15_s7 = int_to_ptr.vmem [resolvable:$true] %s14_s7 }
   0x3   :  { %p80_p1 = scmp.lt.u32.totalorder %s76_s10, %s161_s0 }
   0x5   :  { %p82_p2 = pnand %p80_p1, %p77_p0 }
   0x7   :  { %85 = shalt.err (!%p82_p2)
}
   0x8   :  { %s86_s15 = scalar_lea.vmem %s15_s7, 32  ;;  %p91_p4 = scmp.lt.s32.totalorder %s15_s7, %s15_s7 }
   0x9   :  { %p87_p3 = scmp.ne.s32.totalorder %s15_s7, %s86_s15  ;;  %p92_p5 = scmp.lt.s32.totalorder %s86_s15, %s86_s15 }
   0xb   :  { %p93_p6 = por %p92_p5, %p91_p4 }
   0xd   :  { %p94_p7 = pnand %p93_p6, %p87_p3 }
   0xf   :  { %97 = shalt.err (!%p94_p7)
}
  0x10   :  { %17 = dma.hbm_to_vmem [thread:$0]  %s161_s0, 32, %s15_s7, [#allocation3]  }
  0x11   :  { %120 = dma.done.wait [#allocation3], 32  }
  0x12   :  { %121 = vsyncadd [#allocation3], 4294967264  ;;  %v23_v0 = vlaneseq  ;;  %v21_v4 = vld [vmem:[#allocation2] sm:$0x3]  ;;  %s125_s18 = smov [#allocation5]   ;;  %v126_v10 = vmov 0.0  }
  0x13   :  { %v22_v5 = vunpack.c.0.s8 %v21_v4  ;;  %s62_s19 = sshll.u32 %s125_s18, 4  ;;  %s63_s19 = int_to_ptr.vmem [resolvable:$true] %s62_s19 }
  0x14   :  { %v24_v1 = vshrl.u32 %v23_v0, 7  ;;  %s98_s0 = scalar_lea.vmem %s63_s19, 128  ;;  %p103_p9 = scmp.lt.s32.totalorder %s63_s19, %s63_s19 }
  0x15   :  { %p99_p8 = scmp.ne.s32.totalorder %s63_s19, %s98_s0  ;;  %p104_p10 = scmp.lt.s32.totalorder %s98_s0, %s98_s0 }
  0x16   :  { %v25_v2 = vsub.s32 0, %v24_v1  ;;  %v29_v3 = vsub.s32 4, %v24_v1 }
  0x17   :  { %p105_p11 = por %p104_p10, %p103_p9 }
  0x18   :  { %v26_v6 = vrot.slane %v22_v5, %v25_v2  ;;  %v30_v7 = vrot.slane %v22_v5, %v29_v3 }
  0x19   :  { %p106_p12 = pnand %p105_p11, %p99_p8 }
  0x1a   :  { %v34_v8 = vrot.slane %v26_v6, %v25_v2  ;;  %v38_v9 = vrot.slane %v30_v7, %v25_v2 }
  0x1c   :  { %vm41_vm0 = vcmp.eq.s32.totalorder %v34_v8, %v24_v1  ;;  %vm42_vm1 = vcmp.eq.s32.totalorder %v38_v9, %v24_v1  ;;  %vm47_vm2 = vcmp.eq.s32.totalorder %v34_v8, 4  ;;  %vm48_vm3 = vcmp.eq.s32.totalorder %v38_v9, 4 }
  0x1d   :  { %v71_v11 = vsel %vm41_vm0, 1.0, %v126_v10  ;;  %v72_v12 = vsel %vm42_vm1, 1.0, %v126_v10 }
  0x1e   :  { %v49_v13 = vsel %vm47_vm2, 0.25, %v71_v11  ;;  %v50_v14 = vsel %vm48_vm3, 0.25, %v72_v12 }
  0x1f   :  { %v53_v15 = vcombine.low %v49_v13, %v50_v14 }
  0x21   :  { %55 = vst [vmem:[#allocation5] sm:$0xff] %v53_v15 }
  0x22   :  { %109 = shalt.err (!%p106_p12)
}
  0x23   :  { %s110_s22 = scalar_lea.hbm %s162_s1, 128 }
  0x24   :  { %p111_p13 = scmp.ne.s32.totalorder %s162_s1, %s110_s22  ;;  %p114_p0 = scmp.lt.u32.totalorder %s110_s22, %s162_s1 }
  0x26   :  { %p116_p1 = pnand %p114_p0, %p111_p13 }
  0x28   :  { %119 = shalt.err (!%p116_p1)
}
  0x29   :  { %65 = dma.vmem_to_hbm [thread:$0]  %s63_s19, 128, %s162_s1, [#allocation4]  }
  0x2a   :  { %122 = dma.done.wait [#allocation4], 128  }
  0x2b   :  { %123 = vsyncadd [#allocation4], 4294967168 }
  0x2c   :  { %69 = vsyncpa [#allocation3], 1 }
  0x2d   :  { %70 = vsyncpa [#allocation4], 1 }

</bundles_post_ra>
